<compile_context>
chip_gen: v5e
topology: v5e:2x2
jax: 0.10.0
libtpu: 0.0.40
codegen_flags: <defaults>
</compile_context>

<pallas_src>
import math

import jax
import jax.numpy as jnp
from jax.experimental import pallas as pl
from jax.experimental.pallas import tpu as pltpu


def _group_sizes(D, obs):
    """Smallest row-group G such that both G*D and G*obs are multiples of 128 lanes."""
    g_in = 128 // math.gcd(D, 128)
    g_out = 128 // math.gcd(obs, 128)
    G = math.lcm(g_in, g_out)
    return G, G * D, G * obs


def _parabola_decoder_kernel(x_ref, wc_ref, bias_ref, o_ref):
    # x_ref:    (tr, GD)     lane-dense tile; each sublane row packs G latent rows
    # wc_ref:   (2*GD, GO)   stacked block-diagonal [kron(I_G, Wz); kron(I_G, alpha*we)]
    # bias_ref: (1, GO)      bias tiled G times along lanes (f32)
    # o_ref:    (tr, GO)     lane-dense output tile (same memory as (tr*G, obs) row-major)
    x = x_ref[...]
    xc = jnp.concatenate([x, x * x], axis=-1)                        # (tr, 2*GD)
    y = jnp.dot(xc, wc_ref[...], preferred_element_type=jnp.float32)  # one K=2*GD GEMM
    o_ref[...] = (y + bias_ref[...]).astype(o_ref.dtype)


def prepare_parabola_decoder(W, b, alpha, *, compute_dtype=jnp.float32):
    """Precompute the lane-dense fused weight & tiled bias.

    Call once per (W, b, alpha) and reuse across decoder calls — removes per-call
    kron/tile/transpose ops in front of the kernel launch.
    W: [obs, D+1] (PyTorch nn.Linear layout), b: [obs], alpha: scalar.
    """
    obs, d_plus_1 = W.shape
    D = d_plus_1 - 1
    G, GD, GO = _group_sizes(D, obs)

    wc_bytes = 2 * GD * GO * jnp.dtype(compute_dtype).itemsize
    if wc_bytes > (4 << 20):
        # TODO(synk): for larger D/obs the kron-expanded weight scales as G^2*D*obs and
        # would overflow scoped/physical VMEM (and inflate MXU work by G); switch to a
        # plain (D+1, obs) weight with an in-kernel relayout instead of failing here.
        raise ValueError(
            f"block-diagonal fused weight needs {wc_bytes} bytes of VMEM "
            f"(latent_dims={D}, observation_dims={obs}); too large for the kron layout")

    W32 = W.astype(jnp.float32)
    wz = W32[:, :D].T                                             # (D, obs)
    we = jnp.asarray(alpha, jnp.float32) * W32[:, D]              # (obs,), alpha folded in
    eye_g = jnp.eye(G, dtype=jnp.float32)
    A = jnp.kron(eye_g, wz)                                       # (GD, GO)  Z @ Wz
    Bm = jnp.kron(eye_g, jnp.tile(we[None, :], (D, 1)))           # (GD, GO)  sum(Z^2)*alpha*we
    Wc = jnp.concatenate([A, Bm], axis=0).astype(compute_dtype)   # (2*GD, GO) stacked
    bias_row = jnp.tile(b.astype(jnp.float32), G)[None, :]        # (1, GO)
    return dict(D=D, obs=obs, G=G, GD=GD, GO=GO, Wc=Wc, bias_row=bias_row)


def _run_lane_dense(x_dense, Wc, bias_row, GO, out_dtype, tr_target):
    """pallas_call over a lane-dense (R, GD) slab -> (R, GO)."""
    R, GD = x_dense.shape
    if R <= tr_target:
        if R >= 16:
            # Force >= 2 grid steps so ("parallel",) can use both v7x TensorCores.
            half = -(-R // 2)
            tr = -(-half // 8) * 8          # multiple of 8, <= R for R >= 16
        else:
            tr = R                          # single full-extent block (no 8-multiple needed)
    else:
        tr = max(8, (tr_target // 8) * 8)
    grid = (pl.cdiv(R, tr),)

    return pl.pallas_call(
        _parabola_decoder_kernel,
        out_shape=jax.ShapeDtypeStruct((R, GO), out_dtype),
        grid=grid,
        in_specs=[
            pl.BlockSpec((tr, GD), lambda i: (i, 0)),        # lane-dense latents
            # Constant operands (index_map is constant); kept auto-pipelined — they are
            # only ~0.25 MiB so the extra buffer is negligible.
            pl.BlockSpec(Wc.shape, lambda i: (0, 0)),        # fused weight, VMEM resident
            pl.BlockSpec(bias_row.shape, lambda i: (0, 0)),  # tiled bias
        ],
        out_specs=pl.BlockSpec((tr, GO), lambda i: (i, 0)),
        compiler_params=pltpu.CompilerParams(
            dimension_semantics=("parallel",),
            vmem_limit_bytes=48 * 1024 * 1024),
    )(x_dense, Wc, bias_row)


def parabola_decoder_apply(Z, prep, *, tr=4096):
    """Fused HighDParabolaDecoder forward.

    Z: [..., latent_dims]; prep: result of prepare_parabola_decoder.
    `tr` = lane-dense rows per grid step (sweepable: ~4096 on v5e, ~8192 on v6e/v7x).
    Returns [..., observation_dims].
    """
    D, obs, G = prep["D"], prep["obs"], prep["G"]
    GD, GO = prep["GD"], prep["GO"]
    Wc, bias_row = prep["Wc"], prep["bias_row"]
    assert Z.shape[-1] == D
    lead = Z.shape[:-1]
    M = math.prod(lead)
    x_flat = Z.reshape(M, D)
    out_dtype = Z.dtype

    M_main = (M // G) * G
    pieces = []
    if M_main:
        # Zero-copy lane-dense relabel of the aligned prefix (the whole array when M % G == 0).
        x_main = x_flat[:M_main].reshape(M_main // G, GD)
        o_main = _run_lane_dense(x_main, Wc, bias_row, GO, out_dtype, tr)
        pieces.append(o_main.reshape(M_main, obs))
    tail = M - M_main
    if tail:
        # < G leftover rows: pad only this tiny tail to one lane-dense row (few hundred bytes).
        # TODO(synk): a manual-DMA (memory_space=pl.ANY) path would also avoid the output
        # concatenate below for misaligned M; the aligned case (common) is already copy-free.
        x_tail = jnp.pad(x_flat[M_main:], ((0, G - tail), (0, 0))).reshape(1, GD)
        o_tail = _run_lane_dense(x_tail, Wc, bias_row, GO, out_dtype, tr)
        pieces.append(o_tail.reshape(G, obs)[:tail])

    out_flat = pieces[0] if len(pieces) == 1 else jnp.concatenate(pieces, axis=0)
    return out_flat.reshape(*lead, obs)


def parabola_decoder(Z, alpha, W, b, **kwargs):
    """One-shot convenience wrapper (prefer prepare_... + ..._apply for repeated calls)."""
    return parabola_decoder_apply(Z, prepare_parabola_decoder(W, b, alpha), **kwargs)


def parabola_decoder_ref(Z, alpha, W, b):
    """Pure-JAX reference matching the PyTorch forward exactly."""
    extra = jnp.sum(Z * Z, axis=-1, keepdims=True)             # ||Z||^2
    parabola = jnp.concatenate([Z, alpha * extra], axis=-1)     # [..., D+1]
    return parabola @ W.T + b


def _check(Z, prep, alpha, W, b, **kw):
    out = parabola_decoder_apply(Z, prep, **kw)
    jax.block_until_ready(out)
    ref = parabola_decoder_ref(Z, alpha, W, b)
    assert out.shape == ref.shape
    assert jnp.allclose(out, ref, atol=1e-5, rtol=1e-5), (
        f"max abs err = {jnp.max(jnp.abs(out - ref))}")
    return out


if __name__ == "__main__":
    latent_dims, observation_dims = 4, 8

    key = jax.random.PRNGKey(0)
    k_z1, k_z2, k_z3, k_w, k_b = jax.random.split(key, 5)

    # Deterministic parameter init mimicking nn.Linear (uniform +-1/sqrt(fan_in)).
    fan_in = latent_dims + 1
    bound = 1.0 / math.sqrt(fan_in)
    W = jax.random.uniform(k_w, (observation_dims, latent_dims + 1),
                           minval=-bound, maxval=bound, dtype=jnp.float32)
    b = jax.random.uniform(k_b, (observation_dims,),
                           minval=-bound, maxval=bound, dtype=jnp.float32)
    alpha = jnp.float32(0.75)

    prep = prepare_parabola_decoder(W, b, alpha)   # once per parameter set, reused below

    # [batch, samples, timesteps, latent_dims]
    Z1 = jax.random.normal(k_z1, (2, 2, 8, latent_dims), dtype=jnp.float32)
    _check(Z1, prep, alpha, W, b)          # M=32: single full-extent block, zero-copy (no pad)

    Z2 = jax.random.normal(k_z2, (2, 4, 128, latent_dims), dtype=jnp.float32)
    _check(Z2, prep, alpha, W, b)          # M=1024: 2-step grid (v7x megacore split)
    _check(Z2, prep, alpha, W, b, tr=8)    # small-tile multi-step pipelined grid

    Z3 = jax.random.normal(k_z3, (2, 3, 7, latent_dims), dtype=jnp.float32)
    _check(Z3, prep, alpha, W, b)          # M=42: aligned prefix + tiny padded tail path

    print("KERNEL_OK")
</pallas_src>

<mosaic_0001>
module attributes {stable_mosaic.version = 11 : i64} {
  func.func @_parabola_decoder_kernel(%arg0: i32, %arg1: memref<1x128xf32, #tpu.memory_space<vmem>>, %arg2: memref<256x256xf32, #tpu.memory_space<vmem>>, %arg3: memref<1x256xf32, #tpu.memory_space<vmem>>, %arg4: memref<1x256xf32, #tpu.memory_space<vmem>>) attributes {dimension_semantics = [#tpu.dimension_semantics<parallel>], iteration_bounds = array<i64: 1>, scalar_prefetch = 0 : i64, scratch_operands = 0 : i64, tpu.core_type = #tpu.core_type<tc>, window_params = [{transform_indices = @transform_0, window_bounds = array<i64: 1, 128>}, {pipeline_mode = #tpu.pipeline_mode<synchronous>, transform_indices = @transform_1, window_bounds = array<i64: 256, 256>}, {pipeline_mode = #tpu.pipeline_mode<synchronous>, transform_indices = @transform_2, window_bounds = array<i64: 1, 256>}, {transform_indices = @transform_3, window_bounds = array<i64: 1, 256>}]} {
    %c0 = arith.constant 0 : index
    %c0_0 = arith.constant 0 : index
    %0 = vector.load %arg1[%c0, %c0_0] : memref<1x128xf32, #tpu.memory_space<vmem>>, vector<1x128xf32>
    %1 = arith.mulf %0, %0 : vector<1x128xf32>
    %2 = tpu.concatenate %0, %1 in 1 : vector<1x128xf32>, vector<1x128xf32> -> vector<1x256xf32>
    %c0_1 = arith.constant 0 : index
    %c0_2 = arith.constant 0 : index
    %3 = vector.load %arg2[%c0_1, %c0_2] : memref<256x256xf32, #tpu.memory_space<vmem>>, vector<256x256xf32>
    %cst = arith.constant dense<0.000000e+00> : vector<1x256xf32>
    %4 = tpu.matmul %2, %3, %cst {dimension_numbers = #tpu.dot_dimension_numbers<[1], [0], [0], [1], [0, 0, 1, 1], [], []>} : vector<1x256xf32>, vector<256x256xf32>, vector<1x256xf32> -> vector<1x256xf32>
    %c0_3 = arith.constant 0 : index
    %c0_4 = arith.constant 0 : index
    %5 = vector.load %arg3[%c0_3, %c0_4] : memref<1x256xf32, #tpu.memory_space<vmem>>, vector<1x256xf32>
    %6 = arith.addf %4, %5 : vector<1x256xf32>
    %c0_5 = arith.constant 0 : index
    %c0_6 = arith.constant 0 : index
    %7 = vector.load %arg4[%c0_5, %c0_6] : memref<1x256xf32, #tpu.memory_space<vmem>>, vector<1x256xf32>
    tpu.vector_store %arg4[%c0_5, %c0_6], %6 {strides = array<i32>} : memref<1x256xf32, #tpu.memory_space<vmem>>, vector<1x256xf32>,
    return
  }
  func.func @transform_0(%arg0: i32) -> (i32, i32) {
    %c0_i32 = arith.constant 0 : i32
    %c0_i32_0 = arith.constant 0 : i32
    return %arg0, %c0_i32 : i32, i32
  }
  func.func @transform_1(%arg0: i32) -> (i32, i32) {
    %c0_i32 = arith.constant 0 : i32
    %c0_i32_0 = arith.constant 0 : i32
    %c0_i32_1 = arith.constant 0 : i32
    return %c0_i32, %c0_i32_0 : i32, i32
  }
  func.func @transform_2(%arg0: i32) -> (i32, i32) {
    %c0_i32 = arith.constant 0 : i32
    %c0_i32_0 = arith.constant 0 : i32
    %c0_i32_1 = arith.constant 0 : i32
    return %c0_i32, %c0_i32_0 : i32, i32
  }
  func.func @transform_3(%arg0: i32) -> (i32, i32) {
    %c0_i32 = arith.constant 0 : i32
    %c0_i32_0 = arith.constant 0 : i32
    return %arg0, %c0_i32 : i32, i32
  }
}

</mosaic_0001>

<bundles_post_ra>
// kernel: tpu_custom_call.1
= control target key start
LH: loop header
LB: loop body
LE: loop exit
PB: predicated region body
PF: predicated region fallthrough
CT: control target
= control target key end

     0   :  { %8 = vsyncpa [#allocation3], 0  ;;  %s385_s0 = inlined_call_operand.hbm [shape: f32[1,128], index: 0, kind: input, shape index: {}]   ;;  %s386_s1 = inlined_call_operand.hbm [shape: f32[256,256], index: 1, kind: input, shape index: {}]   ;;  %s387_s2 = inlined_call_operand.hbm [shape: f32[1,256], index: 2, kind: input, shape index: {}]   ;;  %s388_s3 = inlined_call_operand.hbm [shape: f32[1,256], index: 3, kind: output, shape index: {}]  }
   0x1   :  { %9 = vsyncpa [#allocation6], 0  ;;  %s26_s14 = sshll.u32 %s386_s1, 4  ;;  %s27_s14 = int_to_ptr.hbm [resolvable:$true] %s26_s14 }
   0x2   :  { %10 = vsyncpa [#allocation4], 0  ;;  %s347_s15 = smov [#allocation5]   ;;  %s16_s19 = sshll.u32 %s385_s0, 4  ;;  %s17_s19 = int_to_ptr.hbm [resolvable:$true] %s16_s19 }
   0x3   :  { %s28_s16 = sshll.u32 %s347_s15, 4  ;;  %s348_s20 = smov 256   ;;  %s29_s16 = int_to_ptr.vmem [resolvable:$true] %s28_s16 }
   0x4   :  { %s349_s21 = smov 16   ;;  %s350_s22 = smov [#allocation2]  }
   0x5   :  { %34 = dma.hbm_to_vmem [thread:$0]  %s27_s14, 8192, %s29_s16, [#allocation6], %s348_s20, %s348_s20, %s349_s21  }
   0x6   :  { %s18_s23 = sshll.u32 %s350_s22, 4  ;;  %s40_s26 = sshll.u32 %s387_s2, 4  ;;  %s19_s23 = int_to_ptr.vmem [resolvable:$true] %s18_s23  ;;  %s41_s26 = int_to_ptr.hbm [resolvable:$true] %s40_s26 }
   0x7   :  { %21 = dma.hbm_to_vmem [thread:$0]  %s17_s19, 16, %s19_s23, [#allocation3]  }
   0x8   :  { %s351_s1 = smov [#allocation7]  }
   0x9   :  { %s42_s27 = sshll.u32 %s351_s1, 4  ;;  %s43_s27 = int_to_ptr.vmem [resolvable:$true] %s42_s27 }
   0xa   :  { %45 = dma.hbm_to_vmem [thread:$0]  %s41_s26, 32, %s43_s27, [#allocation6]  }
   0xb   :  { %341 = dma.done.wait [#allocation3], 16  }
   0xc   :  { %342 = vsyncadd [#allocation3], 4294967280 }
   0xd   :  { %343 = dma.done.wait [#allocation6], 8224  }
   0xe   :  { %344 = vsyncadd [#allocation6], 4294959072  ;;  %v91_v0 = vld [vmem:[#allocation5 + $0xf8] sm:$0xff]  ;;  %v89_v1 = vld [vmem:[#allocation5 + $0xe8] sm:$0xff]  ;;  %s352_s0 = smov [#allocation8]   ;;  %s228_s30 = sshll.u32 %s388_s3, 4  ;;  %s229_s30 = int_to_ptr.hbm [resolvable:$true] %s228_s30 }
   0xf   :  { %v123_v2 = vld [vmem:[#allocation5 + $0x1f8] sm:$0xff]  ;;  %170 = vmatpush.msra.mxu2 %v91_v0  ;;  %v121_v3 = vld [vmem:[#allocation5 + $0x1e8] sm:$0xff]  ;;  %v90_v6 = vld [vmem:[#allocation5 + $0xf0] sm:$0xff]  ;;  %s226_s2 = sshll.u32 %s352_s0, 4  ;;  %vm213_vm0 = vcmask 1040384   ;;  %s227_s2 = int_to_ptr.vmem [resolvable:$true] %s226_s2 }
  0x10   :  { %190 = vmatpush.msra.mxu3 %v123_v2  ;;  %v87_v4 = vld [vmem:[#allocation5 + $0xd8] sm:$0xff]  ;;  %v88_v7 = vld [vmem:[#allocation5 + $0xe0] sm:$0xff]  ;;  %v122_v8 = vld [vmem:[#allocation5 + $0x1f0] sm:$0xff]  ;;  %130 = vmatpush.msra.mxu0 %v90_v6 }
  0x11   :  { %v119_v5 = vld [vmem:[#allocation5 + $0x1d8] sm:$0xff]  ;;  %171 = vmatpush.msra.mxu2 %v89_v1  ;;  %v85_v9 = vld [vmem:[#allocation5 + $0xc8] sm:$0xff]  ;;  %150 = vmatpush.msra.mxu1 %v122_v8  ;;  %v86_v11 = vld [vmem:[#allocation5 + $0xd0] sm:$0xff] }
  0x12   :  { %191 = vmatpush.msra.mxu3 %v121_v3  ;;  %v117_v10 = vld [vmem:[#allocation5 + $0x1c8] sm:$0xff]  ;;  %v120_v12 = vld [vmem:[#allocation5 + $0x1e0] sm:$0xff]  ;;  %v83_v13 = vld [vmem:[#allocation5 + $0xb8] sm:$0xff]  ;;  %131 = vmatpush.msra.mxu0 %v88_v7 }
  0x13   :  { %172 = vmatpush.msra.mxu2 %v87_v4  ;;  %v115_v14 = vld [vmem:[#allocation5 + $0x1b8] sm:$0xff]  ;;  %151 = vmatpush.msra.mxu1 %v120_v12  ;;  %v118_v15 = vld [vmem:[#allocation5 + $0x1d0] sm:$0xff]  ;;  %v84_v16 = vld [vmem:[#allocation5 + $0xc0] sm:$0xff] }
  0x14   :  { %192 = vmatpush.msra.mxu3 %v119_v5  ;;  %v116_v17 = vld [vmem:[#allocation5 + $0x1c0] sm:$0xff]  ;;  %v81_v18 = vld [vmem:[#allocation5 + $0xa8] sm:$0xff]  ;;  %132 = vmatpush.msra.mxu0 %v86_v11  ;;  %v82_v20 = vld [vmem:[#allocation5 + $0xb0] sm:$0xff]  ;;  %v216_v11 = vlaneseq }
  0x15   :  { %173 = vmatpush.msra.mxu2 %v85_v9  ;;  %v113_v19 = vld [vmem:[#allocation5 + $0x1a8] sm:$0xff]  ;;  %152 = vmatpush.msra.mxu1 %v118_v15  ;;  %v114_v21 = vld [vmem:[#allocation5 + $0x1b0] sm:$0xff]  ;;  %v79_v22 = vld [vmem:[#allocation5 + $0x98] sm:$0xff] }
  0x16   :  { %193 = vmatpush.msra.mxu3 %v117_v10  ;;  %133 = vmatpush.msra.mxu0 %v84_v16  ;;  %v111_v23 = vld [vmem:[#allocation5 + $0x198] sm:$0xff]  ;;  %v80_v24 = vld [vmem:[#allocation5 + $0xa0] sm:$0xff]  ;;  %v77_v26 = vld [vmem:[#allocation5 + $0x88] sm:$0xff]  ;;  %vm218_vm1 = vcmp.lt.s32.totalorder %v216_v11, 256 }
  0x17   :  { %174 = vmatpush.msra.mxu2 %v83_v13  ;;  %153 = vmatpush.msra.mxu1 %v116_v17  ;;  %v112_v25 = vld [vmem:[#allocation5 + $0x1a0] sm:$0xff]  ;;  %v109_v27 = vld [vmem:[#allocation5 + $0x188] sm:$0xff]  ;;  %v78_v28 = vld [vmem:[#allocation5 + $0x90] sm:$0xff] }
  0x18   :  { %194 = vmatpush.msra.mxu3 %v115_v14  ;;  %134 = vmatpush.msra.mxu0 %v82_v20  ;;  %v110_v29 = vld [vmem:[#allocation5 + $0x190] sm:$0xff]  ;;  %v75_v30 = vld [vmem:[#allocation5 + $0x78] sm:$0xff]  ;;  %v76_v32 = vld [vmem:[#allocation5 + $0x80] sm:$0xff] }
  0x19   :  { %175 = vmatpush.msra.mxu2 %v81_v18  ;;  %154 = vmatpush.msra.mxu1 %v114_v21  ;;  %v107_v31 = vld [vmem:[#allocation5 + $0x178] sm:$0xff]  ;;  %v108_v33 = vld [vmem:[#allocation5 + $0x180] sm:$0xff]  ;;  %v73_v34 = vld [vmem:[#allocation5 + $0x68] sm:$0xff] }
  0x1a   :  { %195 = vmatpush.msra.mxu3 %v113_v19  ;;  %135 = vmatpush.msra.mxu0 %v80_v24  ;;  %v105_v35 = vld [vmem:[#allocation5 + $0x168] sm:$0xff]  ;;  %v74_v36 = vld [vmem:[#allocation5 + $0x70] sm:$0xff]  ;;  %v71_v38 = vld [vmem:[#allocation5 + $0x58] sm:$0xff] }
  0x1b   :  { %176 = vmatpush.msra.mxu2 %v79_v22  ;;  %155 = vmatpush.msra.mxu1 %v112_v25  ;;  %v106_v37 = vld [vmem:[#allocation5 + $0x170] sm:$0xff]  ;;  %v103_v39 = vld [vmem:[#allocation5 + $0x158] sm:$0xff]  ;;  %v72_v40 = vld [vmem:[#allocation5 + $0x60] sm:$0xff] }
  0x1c   :  { %196 = vmatpush.msra.mxu3 %v111_v23  ;;  %136 = vmatpush.msra.mxu0 %v78_v28  ;;  %v104_v41 = vld [vmem:[#allocation5 + $0x160] sm:$0xff]  ;;  %v69_v42 = vld [vmem:[#allocation5 + $0x48] sm:$0xff]  ;;  %v70_v44 = vld [vmem:[#allocation5 + $0x50] sm:$0xff] }
  0x1d   :  { %177 = vmatpush.msra.mxu2 %v77_v26  ;;  %156 = vmatpush.msra.mxu1 %v110_v29  ;;  %v101_v43 = vld [vmem:[#allocation5 + $0x148] sm:$0xff]  ;;  %v102_v45 = vld [vmem:[#allocation5 + $0x150] sm:$0xff]  ;;  %v67_v46 = vld [vmem:[#allocation5 + $0x38] sm:$0xff] }
  0x1e   :  { %197 = vmatpush.msra.mxu3 %v109_v27  ;;  %137 = vmatpush.msra.mxu0 %v76_v32  ;;  %v99_v47 = vld [vmem:[#allocation5 + $0x138] sm:$0xff]  ;;  %v68_v48 = vld [vmem:[#allocation5 + $0x40] sm:$0xff]  ;;  %v65_v50 = vld [vmem:[#allocation5 + $0x28] sm:$0xff] }
  0x1f   :  { %178 = vmatpush.msra.mxu2 %v75_v30  ;;  %157 = vmatpush.msra.mxu1 %v108_v33  ;;  %v100_v49 = vld [vmem:[#allocation5 + $0x140] sm:$0xff]  ;;  %v97_v51 = vld [vmem:[#allocation5 + $0x128] sm:$0xff]  ;;  %v58_v52 = vld [vmem:[#allocation2] sm:$0x1] }
  0x20   :  { %198 = vmatpush.msra.mxu3 %v107_v31  ;;  %138 = vmatpush.msra.mxu0 %v74_v36  ;;  %v66_v53 = vld [vmem:[#allocation5 + $0x30] sm:$0xff]  ;;  %v63_v55 = vld [vmem:[#allocation5 + $0x18] sm:$0xff]  ;;  %v64_v57 = vld [vmem:[#allocation5 + $0x20] sm:$0xff]  ;;  %v59_v61 = vmul.f32 %v58_v52, %v58_v52 }
  0x21   :  { %179 = vmatpush.msra.mxu2 %v73_v34  ;;  %158 = vmatpush.msra.mxu1 %v106_v37  ;;  %v98_v54 = vld [vmem:[#allocation5 + $0x130] sm:$0xff]  ;;  %v95_v56 = vld [vmem:[#allocation5 + $0x118] sm:$0xff]  ;;  %v96_v58 = vld [vmem:[#allocation5 + $0x120] sm:$0xff] }
  0x22   :  { %199 = vmatpush.msra.mxu3 %v105_v35  ;;  %139 = vmatpush.msra.mxu0 %v72_v40  ;;  %v61_v59 = vld [vmem:[#allocation5 + $0x8] sm:$0xff]  ;;  %v62_v62 = vld [vmem:[#allocation5 + $0x10] sm:$0xff]  ;;  %v60_v0 = vld [vmem:[#allocation5] sm:$0xff] }
  0x23   :  { %180 = vmatpush.msra.mxu2 %v71_v38  ;;  %159 = vmatpush.msra.mxu1 %v104_v41  ;;  %v93_v60 = vld [vmem:[#allocation5 + $0x108] sm:$0xff]  ;;  %v94_v63 = vld [vmem:[#allocation5 + $0x110] sm:$0xff]  ;;  %v92_v1 = vld [vmem:[#allocation5 + $0x100] sm:$0xff] }
  0x24   :  { %200 = vmatpush.msra.mxu3 %v103_v39  ;;  %140 = vmatpush.msra.mxu0 %v70_v44  ;;  %v124_v2 = vld [vmem:[#allocation7] sm:$0x3] }
  0x25   :  { %181 = vmatpush.msra.mxu2 %v69_v42  ;;  %160 = vmatpush.msra.mxu1 %v102_v45  ;;  %v126_v3 = vperm.slane %v124_v2, 0  ;;  %v127_v4 = vperm.slane %v124_v2, 1 }
  0x26   :  { %201 = vmatpush.msra.mxu3 %v101_v43  ;;  %141 = vmatpush.msra.mxu0 %v68_v48 }
  0x27   :  { %182 = vmatpush.msra.mxu2 %v67_v46  ;;  %161 = vmatpush.msra.mxu1 %v100_v49 }
  0x28   :  { %202 = vmatpush.msra.mxu3 %v99_v47  ;;  %142 = vmatpush.msra.mxu0 %v66_v53 }
  0x29   :  { %183 = vmatpush.msra.mxu2 %v65_v50  ;;  %162 = vmatpush.msra.mxu1 %v98_v54 }
  0x2a   :  { %203 = vmatpush.msra.mxu3 %v97_v51  ;;  %143 = vmatpush.msra.mxu0 %v64_v57 }
  0x2b   :  { %184 = vmatpush.msra.mxu2 %v63_v55  ;;  %163 = vmatpush.msra.mxu1 %v96_v58 }
  0x2c   :  { %204 = vmatpush.msra.mxu3 %v95_v56  ;;  %144 = vmatpush.msra.mxu0 %v62_v62 }
  0x2d   :  { %185 = vmatpush.msra.mxu2 %v61_v59  ;;  %164 = vmatpush.msra.mxu1 %v94_v63 }
  0x2e   :  { %205 = vmatpush.msra.mxu3 %v93_v60  ;;  %186 = vmatmul.f32.vlgmr.msra.gmra.mxu2 %v58_v52 }
  0x2f   :  { %206 = vmatmul.f32.vlgmr.msra.gmra.mxu3 %v59_v61  ;;  %145 = vmatpush.msra.mxu0 %v60_v0 }
  0x30   :  { %165 = vmatpush.msra.mxu1 %v92_v1  ;;  %146 = vmatmul.f32.vlgmr.msra.gmra.mxu0 %v58_v52 }
  0x31   :  { %166 = vmatmul.f32.vlgmr.msra.gmra.mxu1 %v59_v61 }
  0xad   :  { %v147_v5 = vpop.f32.mrf.mxu0 }
  0xae   :  { %v148_v6 = vadd.f32 %v147_v5, %v126_v3  ;;  %v167_v7 = vpop.f32.mrf.mxu1 }
  0xb0   :  { %v168_v13 = vadd.f32 %v167_v7, %v148_v6 }
  0xb1   :  { %v187_v8 = vpop.f32.mrf.mxu2 }
  0xb2   :  { %v207_v9 = vpop.f32.mrf.mxu3  ;;  %v188_v10 = vadd.f32 %v187_v8, %v127_v4 }
  0xb4   :  { %v208_v12 = vadd.f32 %v207_v9, %v188_v10 }
  0xb6   :  { %v212_v14 = vrot.slane %v208_v12, 7 }
  0xb8   :  { %v214_v15 = vsel %vm213_vm0, %v168_v13, %v212_v14 }
  0xb9   :  { %220 = vst.msk [vmem:[#allocation8] sm:$0x3] %vm218_vm1, %v214_v15 }
  0xba   :  { %231 = dma.vmem_to_hbm [thread:$0]  %s227_s2, 32, %s229_s30, [#allocation4]  }
  0xbb   :  { %345 = dma.done.wait [#allocation4], 32  }
  0xbc   :  { %346 = vsyncadd [#allocation4], 4294967264 }
  0xbd   :  { %236 = vsyncpa [#allocation3], 1 }
  0xbe   :  { %237 = vsyncpa [#allocation6], 1 }
  0xbf   :  { %238 = vsyncpa [#allocation4], 1 }

</bundles_post_ra>
